<compile_context>
chip_gen: v7x
topology: tpu7x:2x2x1
jax: 0.10.0
libtpu: 0.0.40
codegen_flags: <defaults>
</compile_context>

<pallas_src>
import numpy as np
import jax
import jax.numpy as jnp
from jax import lax
from jax.experimental import pallas as pl
from jax.experimental.pallas import tpu as pltpu

_LANE = 128


def _round_up(x, m):
    return (x + m - 1) // m * m


# ---------------------------------------------------------------------------
# Kernel A: avg_pool(5, stride 3) + conv0 (1x1, BN folded) + ReLU
#   One batch element per grid step; pooling matrix / weights stay VMEM-resident.
# ---------------------------------------------------------------------------
def _pool_conv0_kernel(x_ref, pt_ref, w0_ref, b0_ref, h0_ref):
    # x_ref : (1, H*W, C) bf16   NHWC-flattened input, one batch element
    # pt_ref: (P, H*W)    bf16   pooling matrix (P = OH*OW = 25)
    # w0_ref: (C, 128)    bf16   conv0 weight with BN scale folded in
    # b0_ref: (1, 128)    f32    folded BN bias
    # h0_ref: (1, P, 128) bf16
    x_b = x_ref[0]                                                    # (HW, C)
    pooled = jnp.dot(pt_ref[...], x_b,
                     preferred_element_type=jnp.float32)              # (P, C)
    h0 = jnp.dot(pooled.astype(jnp.bfloat16), w0_ref[...],
                 preferred_element_type=jnp.float32)                  # (P, 128)
    h0 = jnp.maximum(h0 + b0_ref[...], 0.0)
    h0_ref[0] = h0.astype(h0_ref.dtype)


def _pool_conv0(x_nhwc, pt, w0f, b0):
    n, hw, c = x_nhwc.shape
    p = pt.shape[0]
    return pl.pallas_call(
        _pool_conv0_kernel,
        out_shape=jax.ShapeDtypeStruct((n, p, 128), jnp.bfloat16),
        grid_spec=pltpu.PrefetchScalarGridSpec(
            num_scalar_prefetch=0,
            grid=(n,),
            in_specs=[
                pl.BlockSpec((1, hw, c), lambda b: (b, 0, 0)),
                pl.BlockSpec((p, hw), lambda b: (0, 0)),
                pl.BlockSpec((c, 128), lambda b: (0, 0)),
                pl.BlockSpec((1, 128), lambda b: (0, 0)),
            ],
            out_specs=pl.BlockSpec((1, p, 128), lambda b: (b, 0, 0)),
        ),
        compiler_params=pltpu.CompilerParams(
            dimension_semantics=("parallel",),
            vmem_limit_bytes=32 * 1024 * 1024,
        ),
    )(x_nhwc, pt, w0f, b0)


# ---------------------------------------------------------------------------
# Kernel B: conv1 (5x5 valid -> 1x1, im2col matmul, BN folded) + ReLU + fc
#   Whole batch in one step; fc output padded to a 128 multiple (lane-dense).
# ---------------------------------------------------------------------------
def _conv1_fc_kernel(h0_ref, w1_ref, b1_ref, wf_ref, bf_ref, o_ref):
    h1 = jnp.dot(h0_ref[...], w1_ref[...],
                 preferred_element_type=jnp.float32)                  # (N, 768)
    h1 = jnp.maximum(h1 + b1_ref[...], 0.0)
    out = jnp.dot(h1.astype(jnp.bfloat16), wf_ref[...],
                  preferred_element_type=jnp.float32) + bf_ref[...]   # (N, NCp)
    o_ref[...] = out.astype(o_ref.dtype)


def _conv1_fc(h0_flat, w1f, b1, wff, bff):
    n, k = h0_flat.shape
    c1 = w1f.shape[1]          # 768
    ncp = wff.shape[1]         # num_classes padded to a multiple of 128
    return pl.pallas_call(
        _conv1_fc_kernel,
        out_shape=jax.ShapeDtypeStruct((n, ncp), jnp.float32),
        grid_spec=pltpu.PrefetchScalarGridSpec(
            num_scalar_prefetch=0,
            grid=(1,),
            in_specs=[
                pl.BlockSpec((n, k), lambda i: (0, 0)),
                pl.BlockSpec((k, c1), lambda i: (0, 0)),
                pl.BlockSpec((1, c1), lambda i: (0, 0)),
                pl.BlockSpec((c1, ncp), lambda i: (0, 0)),
                pl.BlockSpec((1, ncp), lambda i: (0, 0)),
            ],
            out_specs=pl.BlockSpec((n, ncp), lambda i: (0, 0)),
        ),
        compiler_params=pltpu.CompilerParams(
            dimension_semantics=("arbitrary",),
            vmem_limit_bytes=32 * 1024 * 1024,
        ),
    )(h0_flat, w1f, b1, wff, bff)


# ---------------------------------------------------------------------------
# Glue helpers
# ---------------------------------------------------------------------------
def _avg_pool_matrix_t(h, w, k, s, oh, ow):
    """(OH*OW, H*W) matrix PT so that  PT @ x[(h*w), c] == avg_pool2d(x, k, s)."""
    m = np.zeros((oh * ow, h * w), np.float32)
    inv = 1.0 / float(k * k)
    for i in range(oh):
        for j in range(ow):
            for di in range(k):
                for dj in range(k):
                    m[i * ow + j, (i * s + di) * w + (j * s + dj)] = inv
    return m


def _bn_fold(gamma, beta, mean, var, eps=1e-3):
    scale = gamma / jnp.sqrt(var + eps)
    bias = beta - mean * scale
    return scale, bias


def init_params(key, in_channels, num_classes):
    ks = jax.random.split(key, 12)
    f32 = jnp.float32
    p = {}
    # conv0: 1x1, in -> 128   (Conv2d weight layout OIHW, bias=False)
    p["w0"] = 0.02 * jax.random.normal(ks[0], (128, in_channels, 1, 1), f32)
    p["g0"] = 1.0 + 0.1 * jax.random.normal(ks[1], (128,), f32)
    p["b0"] = 0.1 * jax.random.normal(ks[2], (128,), f32)
    p["m0"] = 0.05 * jax.random.normal(ks[3], (128,), f32)
    p["v0"] = 0.5 + jax.random.uniform(ks[4], (128,), f32)
    # conv1: 5x5, 128 -> 768
    p["w1"] = 0.02 * jax.random.normal(ks[5], (768, 128, 5, 5), f32)
    p["g1"] = 1.0 + 0.1 * jax.random.normal(ks[6], (768,), f32)
    p["b1"] = 0.1 * jax.random.normal(ks[7], (768,), f32)
    p["m1"] = 0.05 * jax.random.normal(ks[8], (768,), f32)
    p["v1"] = 0.5 + jax.random.uniform(ks[9], (768,), f32)
    # fc: 768 -> num_classes
    p["wf"] = 0.02 * jax.random.normal(ks[10], (num_classes, 768), f32)
    p["bf"] = 0.1 * jax.random.normal(ks[11], (num_classes,), f32)
    return p


# ---------------------------------------------------------------------------
# InceptionAux forward (Pallas)
# ---------------------------------------------------------------------------
def inception_aux_forward(x, params, num_classes):
    # TODO(synk): BatchNorm runs in inference mode (running statistics folded
    # into the conv weights); PyTorch training-mode batch stats are not used.
    n, c, h, w = x.shape
    oh = (h - 5) // 3 + 1
    ow = (w - 5) // 3 + 1
    assert oh == 5 and ow == 5, "InceptionAux expects a 5x5 map after pooling"
    p = oh * ow
    bf16 = jnp.bfloat16

    # ---- one-time layout / weight-folding glue (tiny, stays in XLA) ----
    x_nhwc = jnp.transpose(x, (0, 2, 3, 1)).reshape(n, h * w, c).astype(bf16)
    pt = jnp.asarray(_avg_pool_matrix_t(h, w, 5, 3, oh, ow)).astype(bf16)

    s0, b0f = _bn_fold(params["g0"], params["b0"], params["m0"], params["v0"])
    w0f = (params["w0"].reshape(128, c).T * s0[None, :]).astype(bf16)      # (C, 128)
    b0f = b0f.reshape(1, 128).astype(jnp.float32)

    s1, b1f = _bn_fold(params["g1"], params["b1"], params["m1"], params["v1"])
    w1f = (params["w1"].transpose(2, 3, 1, 0).reshape(p * 128, 768)
           * s1[None, :]).astype(bf16)                                     # (3200, 768)
    b1f = b1f.reshape(1, 768).astype(jnp.float32)

    ncp = _round_up(num_classes, _LANE)
    wff = jnp.pad(params["wf"].T, ((0, 0), (0, ncp - num_classes))).astype(bf16)
    bff = jnp.pad(params["bf"].reshape(1, -1),
                  ((0, 0), (0, ncp - num_classes))).astype(jnp.float32)

    # ---- kernel A: pool + conv0 + BN + ReLU (grid over batch, megacore) ----
    h0 = _pool_conv0(x_nhwc, pt, w0f, b0f)                 # (N, 25, 128) bf16
    # ---- kernel B: conv1 + BN + ReLU + fc (whole batch, lane-dense out) ----
    h0_flat = h0.reshape(n, p * 128)                       # free contiguous reshape
    out = _conv1_fc(h0_flat, w1f, b1f, wff, bff)           # (N, ncp) f32
    return out[:, :num_classes]


# ---------------------------------------------------------------------------
# Pure-JAX f32 reference (for a sanity check)
# ---------------------------------------------------------------------------
def reference_forward(x, params, num_classes):
    y = lax.reduce_window(x, 0.0, lax.add, (1, 1, 5, 5), (1, 1, 3, 3), "VALID") / 25.0
    dn = ("NCHW", "OIHW", "NCHW")
    y = lax.conv_general_dilated(y, params["w0"], (1, 1), "VALID",
                                 dimension_numbers=dn)
    s0, b0 = _bn_fold(params["g0"], params["b0"], params["m0"], params["v0"])
    y = jnp.maximum(y * s0[None, :, None, None] + b0[None, :, None, None], 0.0)
    y = lax.conv_general_dilated(y, params["w1"], (1, 1), "VALID",
                                 dimension_numbers=dn)
    s1, b1 = _bn_fold(params["g1"], params["b1"], params["m1"], params["v1"])
    y = jnp.maximum(y * s1[None, :, None, None] + b1[None, :, None, None], 0.0)
    y = y.reshape(x.shape[0], -1)
    return y @ params["wf"].T + params["bf"]


if __name__ == "__main__":
    key = jax.random.PRNGKey(0)
    k_x, k_p = jax.random.split(key)

    batch, in_channels, spatial, num_classes = 2, 8, 17, 10
    x = jax.random.normal(k_x, (batch, in_channels, spatial, spatial), jnp.float32)
    params = init_params(k_p, in_channels, num_classes)

    out = inception_aux_forward(x, params, num_classes)
    out = jax.block_until_ready(out)
    assert out.shape == (batch, num_classes), out.shape

    ref = jax.block_until_ready(reference_forward(x, params, num_classes))
    # bf16 MXU operands with f32 accumulation: compare against the f32 reference
    # with an inference-appropriate tolerance.
    np.testing.assert_allclose(np.asarray(out), np.asarray(ref),
                               rtol=5e-2, atol=1e-2)

    print("KERNEL_OK")
</pallas_src>

<mosaic_0001>
module attributes {stable_mosaic.version = 11 : i64} {
  func.func @_pool_conv0_kernel(%arg0: i32, %arg1: memref<1x289x8xbf16, #tpu.memory_space<vmem>>, %arg2: memref<25x289xbf16, #tpu.memory_space<vmem>>, %arg3: memref<8x128xbf16, #tpu.memory_space<vmem>>, %arg4: memref<1x128xf32, #tpu.memory_space<vmem>>, %arg5: memref<1x25x128xbf16, #tpu.memory_space<vmem>>) attributes {dimension_semantics = [#tpu.dimension_semantics<parallel>], iteration_bounds = array<i64: 2>, scalar_prefetch = 0 : i64, scratch_operands = 0 : i64, tpu.core_type = #tpu.core_type<tc>, window_params = [{transform_indices = @transform_0, window_bounds = array<i64: 1, 289, 8>}, {pipeline_mode = #tpu.pipeline_mode<synchronous>, transform_indices = @transform_1, window_bounds = array<i64: 25, 289>}, {pipeline_mode = #tpu.pipeline_mode<synchronous>, transform_indices = @transform_2, window_bounds = array<i64: 8, 128>}, {pipeline_mode = #tpu.pipeline_mode<synchronous>, transform_indices = @transform_3, window_bounds = array<i64: 1, 128>}, {transform_indices = @transform_4, window_bounds = array<i64: 1, 25, 128>}]} {
    %c0 = arith.constant 0 : index
    %c0_0 = arith.constant 0 : index
    %c0_1 = arith.constant 0 : index
    %0 = vector.load %arg1[%c0, %c0_0, %c0_1] : memref<1x289x8xbf16, #tpu.memory_space<vmem>>, vector<1x289x8xbf16>
    %1 = vector.shape_cast %0 : vector<1x289x8xbf16> to vector<289x8xbf16>
    %c0_2 = arith.constant 0 : index
    %c0_3 = arith.constant 0 : index
    %2 = vector.load %arg2[%c0_2, %c0_3] : memref<25x289xbf16, #tpu.memory_space<vmem>>, vector<25x289xbf16>
    %cst = arith.constant dense<0.000000e+00> : vector<25x8xf32>
    %3 = tpu.matmul %2, %1, %cst {dimension_numbers = #tpu.dot_dimension_numbers<[1], [0], [0], [1], [0, 0, 1, 1], [], []>} : vector<25x289xbf16>, vector<289x8xbf16>, vector<25x8xf32> -> vector<25x8xf32>
    %4 = arith.truncf %3 : vector<25x8xf32> to vector<25x8xbf16>
    %c0_4 = arith.constant 0 : index
    %c0_5 = arith.constant 0 : index
    %5 = vector.load %arg3[%c0_4, %c0_5] : memref<8x128xbf16, #tpu.memory_space<vmem>>, vector<8x128xbf16>
    %cst_6 = arith.constant dense<0.000000e+00> : vector<25x128xf32>
    %6 = tpu.matmul %4, %5, %cst_6 {dimension_numbers = #tpu.dot_dimension_numbers<[1], [0], [0], [1], [0, 0, 1, 1], [], []>} : vector<25x8xbf16>, vector<8x128xbf16>, vector<25x128xf32> -> vector<25x128xf32>
    %c0_7 = arith.constant 0 : index
    %c0_8 = arith.constant 0 : index
    %7 = vector.load %arg4[%c0_7, %c0_8] : memref<1x128xf32, #tpu.memory_space<vmem>>, vector<1x128xf32>
    %8 = vector.broadcast %7 : vector<1x128xf32> to vector<25x128xf32>
    %9 = arith.addf %6, %8 : vector<25x128xf32>
    %cst_9 = arith.constant 0.000000e+00 : f32
    %10 = vector.broadcast %cst_9 : f32 to vector<25x128xf32>
    %11 = arith.maximumf %9, %10 : vector<25x128xf32>
    %12 = arith.truncf %11 : vector<25x128xf32> to vector<25x128xbf16>
    %c0_10 = arith.constant 0 : index
    %c0_11 = arith.constant 0 : index
    %c0_12 = arith.constant 0 : index
    %13 = vector.load %arg5[%c0_10, %c0_11, %c0_12] : memref<1x25x128xbf16, #tpu.memory_space<vmem>>, vector<1x25x128xbf16>
    %14 = vector.shape_cast %13 : vector<1x25x128xbf16> to vector<25x128xbf16>
    %15 = vector.shape_cast %12 : vector<25x128xbf16> to vector<1x25x128xbf16>
    tpu.vector_store %arg5[%c0_10, %c0_11, %c0_12], %15 {strides = array<i32>} : memref<1x25x128xbf16, #tpu.memory_space<vmem>>, vector<1x25x128xbf16>,
    return
  }
  func.func @transform_0(%arg0: i32) -> (i32, i32, i32) {
    %c0_i32 = arith.constant 0 : i32
    %c0_i32_0 = arith.constant 0 : i32
    %c0_i32_1 = arith.constant 0 : i32
    return %arg0, %c0_i32, %c0_i32_0 : i32, i32, i32
  }
  func.func @transform_1(%arg0: i32) -> (i32, i32) {
    %c0_i32 = arith.constant 0 : i32
    %c0_i32_0 = arith.constant 0 : i32
    %c0_i32_1 = arith.constant 0 : i32
    return %c0_i32, %c0_i32_0 : i32, i32
  }
  func.func @transform_2(%arg0: i32) -> (i32, i32) {
    %c0_i32 = arith.constant 0 : i32
    %c0_i32_0 = arith.constant 0 : i32
    %c0_i32_1 = arith.constant 0 : i32
    return %c0_i32, %c0_i32_0 : i32, i32
  }
  func.func @transform_3(%arg0: i32) -> (i32, i32) {
    %c0_i32 = arith.constant 0 : i32
    %c0_i32_0 = arith.constant 0 : i32
    %c0_i32_1 = arith.constant 0 : i32
    return %c0_i32, %c0_i32_0 : i32, i32
  }
  func.func @transform_4(%arg0: i32) -> (i32, i32, i32) {
    %c0_i32 = arith.constant 0 : i32
    %c0_i32_0 = arith.constant 0 : i32
    %c0_i32_1 = arith.constant 0 : i32
    return %arg0, %c0_i32, %c0_i32_0 : i32, i32, i32
  }
}

</mosaic_0001>

<bundles_post_ra>
// kernel: tpu_custom_call.1
= control target key start
LH: loop header
LB: loop body
LE: loop exit
PB: predicated region body
PF: predicated region fallthrough
CT: control target
= control target key end

     0   :  { %s828_s15 = smov 0   ;;  %s898_s0 = inlined_call_operand.vmem [shape: bf16[2,289,8], index: 0, kind: input, shape index: {}]   ;;  %s899_s1 = inlined_call_operand.vmem [shape: bf16[25,289], index: 1, kind: input, shape index: {}]   ;;  %s900_s2 = inlined_call_operand.vmem [shape: bf16[8,128], index: 2, kind: input, shape index: {}]   ;;  %s901_s3 = inlined_call_operand.vmem [shape: f32[1,128], index: 3, kind: input, shape index: {}]   ;;  %s902_s4 = inlined_call_operand.vmem [shape: bf16[2,25,128], index: 4, kind: output, shape index: {}]  }
   0x1 LB: > { %s650_s16 = sadd.s32 4294967295, %s800_s15   ;;  %p654_p0 = scmp.ge.s32.totalorder %s800_s15, 1  ;;  %s800_s15 = sphi %s828_s15, %s14_s15  }
   0x2   : > { %p162_p1 = scmp.lt.s32.totalorder %s800_s15, 3 }
   0x4   : > { %p163_p2 = pnand %p654_p0, %p162_p1 }
   0x5   : > { %p188_p3 = scmp.lt.s32.totalorder (!%p163_p2), %s650_s16, 1  ;;  %vm385_vm0 = vcmask (!%p163_p2), 269312   ;;  %v788_v0 = vld [vmem:[%s899_s1 + $0x4] ss:$12 sps:$4 sm:$0xff] (!%p163_p2)   ;;  %v789_v1 = vld [vmem:[%s899_s1 + $0x8] ss:$12 sps:$4 sm:$0xff] (!%p163_p2)  }
   0x6   : > { %166 = sbr.rel (%p163_p2) target bundleno = 501 (0x1f5), region = 36  ;;  %430 = vmatprep.mubr.bf16.mxu0 (!%p163_p2), %v788_v0  ;;  %746 = vmatprep.mubr.msk.bf16.mxu1 (!%p163_p2), %vm385_vm0, %v789_v1  ;;  %vm392_vm1 = vcmask (!%p163_p2), 1040384   ;;  %v802_v15 = vmov (!%p163_p2), 0   ;;  %v790_v21 = vld [vmem:[%s899_s1 + $0x20] ss:$12 sps:$4 sm:$0x1f] (!%p163_p2)  }
   0x7   : > { %v394_v16 = vsel (!%p163_p2), %vm392_vm1, 65535, %v802_v15  ;;  %v786_v25 = vld [vmem:[%s899_s1] ss:$12 sps:$4 sm:$0xff] (!%p163_p2)   ;;  %v791_v26 = vld [vmem:[%s899_s1 + $0x1c] ss:$12 sps:$4 sm:$0x1f] (!%p163_p2)  }
   0x8   : > { %v793_v27 = vld [vmem:[%s899_s1 + $0x18] ss:$12 sps:$4 sm:$0x1f] (!%p163_p2)   ;;  %v498_v28 = vld [vmem:[%s900_s2] sm:$0xf] (!%p163_p2)  ;;  %vm513_vm2 = vcmask (!%p163_p2), 1043456  }
   0x9   : > { %v515_v29 = vsel (!%p163_p2), %vm513_vm2, %v498_v28, 0  ;;  %vm506_vm3 = vcmask (!%p163_p2), 64512   ;;  %v685_v52 = vld [vmem:[%s901_s3] ss:$0 sm:$0xff] (!%p163_p2)  ;;  %vm590_vm4 = vsmask.f32 (!%p163_p2), 256 }
   0xa   : > { %vm591_vm5 = vmand (!%p163_p2), %vm392_vm1, %vm590_vm4 }
   0xd   : > { %s904_s16 = smov (!%p188_p3, %s650_s16), 1 }
   0xe   : > { %s757_s21 = smul.u32 148, %s904_s16  ;;  %s694_s11 = sshll.u32 %s904_s16, 4 }
   0xf   : > { %s197_s14 = scalar_lea.vmem %s902_s4, %s694_s11 }
  0x10   : > { %s849_s24 = scalar_lea.vmem %s898_s0, %s757_s21  ;;  %v592_v1 = vld [vmem:[%s197_s14 + $0xc] sm:$0x1] }
  0x11   : > { %v767_v2 = vld [vmem:[%s849_s24 + $0x40] sm:$0xff]   ;;  %v769_v4 = vld [vmem:[%s849_s24 + $0x48] sm:$0xff]   ;;  %v771_v6 = vld [vmem:[%s849_s24 + $0x50] sm:$0xff]  }
  0x12   : > { %v768_v3 = vld [vmem:[%s849_s24] sm:$0xff]   ;;  %704 = vmatprep.subr.bf16.mxu0 %v767_v2  ;;  %v770_v5 = vld [vmem:[%s849_s24 + $0x8] sm:$0xff]   ;;  %v772_v7 = vld [vmem:[%s849_s24 + $0x10] sm:$0xff]  }
  0x13   : > { %705 = vmatpush3.bf16.msra.mxu0 %v768_v3  ;;  %v773_v8 = vld [vmem:[%s849_s24 + $0x58] sm:$0xff]   ;;  %v775_v10 = vld [vmem:[%s849_s24 + $0x60] sm:$0xff]   ;;  %v782_v13 = vld [vmem:[%s849_s24 + $0x88] sm:$0xff]  }
  0x14   : > { %706 = vmatprep.subr.bf16.mxu0 %v769_v4  ;;  %v774_v9 = vld [vmem:[%s849_s24 + $0x18] sm:$0xff]   ;;  %v779_v11 = vld [vmem:[%s849_s24 + $0x80] sm:$0xff]   ;;  %v777_v14 = vld [vmem:[%s849_s24 + $0x68] sm:$0xff]  }
  0x15   : > { %v776_v12 = vld [vmem:[%s849_s24 + $0x20] sm:$0xff]   ;;  %740 = vmatprep.subr.bf16.mxu1 %v779_v11  ;;  %v785_v17 = vld [vmem:[%s849_s24 + $0x90] ss:$0 sps:$4 sm:$0x11]   ;;  %v778_v18 = vld [vmem:[%s849_s24 + $0x28] sm:$0xff]  }
  0x16   : > { %741 = vmatpush3.bf16.msra.mxu1 %v779_v11  ;;  %v780_v19 = vld [vmem:[%s849_s24 + $0x70] sm:$0xff]   ;;  %v396_v20 = vand.u32 %v785_v17, %v394_v16  ;;  %v783_v23 = vld [vmem:[%s849_s24 + $0x78] sm:$0xff]  }
  0x17   : > { %707 = vmatpush3.bf16.msra.mxu0 %v770_v5  ;;  %742 = vmatprep.subr.bf16.mxu1 %v782_v13  ;;  %v781_v22 = vld [vmem:[%s849_s24 + $0x30] sm:$0xff]   ;;  %v784_v24 = vld [vmem:[%s849_s24 + $0x38] sm:$0xff]  }
  0x18   : > { %708 = vmatprep.subr.bf16.mxu0 %v771_v6 }
  0x1a   : > { %743 = vmatpush3.bf16.msra.mxu1 %v782_v13 }
  0x1b   : > { %709 = vmatpush3.bf16.msra.mxu0 %v772_v7  ;;  %744 = vmatprep.subr.bf16.mxu1 %v396_v20 }
  0x1c   : > { %710 = vmatprep.subr.bf16.mxu0 %v773_v8 }
  0x1e   : > { %745 = vmatpush3.bf16.msra.mxu1 %v396_v20 }
  0x1f   : > { %711 = vmatpush3.bf16.msra.mxu0 %v774_v9  ;;  %756 = vmatprep.subr.msk.bf16.mxu1 %vm513_vm2, %v498_v28 }
  0x20   : > { %712 = vmatprep.subr.bf16.mxu0 %v775_v10 }
  0x21   : > { %747 = vmatmul.mubr.msk.bf16.vlgmr.msra.gmra.mrb[0].mxu1 %vm385_vm0, %v790_v21 }
  0x22   : > { %751 = vmatpush3.bf16.msra.mxu1 %v515_v29 }
  0x23   : > { %713 = vmatpush3.bf16.msra.mxu0 %v776_v12 }
  0x24   : > { %714 = vmatprep.subr.bf16.mxu0 %v777_v14 }
  0x27   : > { %715 = vmatpush3.bf16.msra.mxu0 %v778_v18 }
  0x28   : > { %716 = vmatprep.subr.bf16.mxu0 %v780_v19 }
  0x2b   : > { %717 = vmatpush3.bf16.msra.mxu0 %v781_v22 }
  0x2c   : > { %718 = vmatprep.subr.bf16.mxu0 %v783_v23 }
  0x2f   : > { %719 = vmatpush3.bf16.msra.mxu0 %v784_v24 }
  0x32   : > { %431 = vmatmul.mubr.bf16.vlgmr.msra.gmra.mrb[0].mxu0 %v786_v25 }
  0x33   : > { %438 = vmatprep.mubr.bf16.mxu0 %v791_v26 }
  0x3a   : > { %439 = vmatmul.mubr.bf16.gmra.mrb[4].mxu0 %v793_v27 }
  0xf4   : > { %v748_v30 = vpop.f32.mrb[0].mxu1 }
  0xf5   : > { %v481_v31 = vpop.f32.mrb[1].mxu1 }
  0xf6   : > { %v749_v32 = vpop.f32.mrb[2].mxu1 }
  0xf7   : > { %v484_v33 = vpop.f32.mrb[3].mxu1 }
 0x105   : > { %v720_v34 = vpop.f32.mrb[0].mxu0 }
 0x106   : > { %v721_v35 = vpop.f32.mrb[1].mxu0 }
 0x107   : > { %v722_v36 = vadd.f32 %v721_v35, %v720_v34  ;;  %v723_v37 = vpop.f32.mrb[2].mxu0 }
 0x108   : > { %v724_v38 = vpop.f32.mrb[3].mxu0 }
 0x109   : > { %v725_v39 = vadd.f32 %v724_v38, %v723_v37  ;;  %v482_v40 = vadd.f32 %v722_v36, %v481_v31 }
 0x10b   : > { %v485_v41 = vadd.f32 %v725_v39, %v484_v33 }
 0x10d   : > { %v496_v42 = vpack.c.bf16 %v485_v41, %v482_v40  ;;  %v726_v43 = vpop.f32.mrb[4].mxu0 }
 0x10e   : > { %v727_v44 = vpop.f32.mrb[5].mxu0 }
 0x10f   : > { %v728_v45 = vadd.f32 %v727_v44, %v726_v43  ;;  %v729_v46 = vpop.f32.mrb[6].mxu0  ;;  %752 = vmatprep.mubr.msk.bf16.mxu1 %vm506_vm3, %v496_v42 }
 0x110   : > { %v730_v47 = vpop.f32.mrb[7].mxu0 }
 0x111   : > { %v490_v48 = vadd.f32 %v748_v30, %v728_v45  ;;  %v731_v49 = vadd.f32 %v730_v47, %v729_v46 }
 0x113   : > { %v493_v50 = vadd.f32 %v749_v32, %v731_v49 }
 0x115   : > { %v497_v51 = vpack.c.bf16 %v493_v50, %v490_v48 }
 0x117   : > { %753 = vmatmul.mubr.msk.bf16.vlgmr.msra.gmra.mrb[4].mxu1 %vm506_vm3, %v497_v51 }
 0x1ea   : > { %v754_v53 = vpop.f32.mrb[4].mxu1 }
 0x1eb   : > { %v560_v54 = vadd.f32 %v754_v53, %v685_v52  ;;  %v551_v55 = vpop.f32.mrb[5].mxu1 }
 0x1ec   : > { %v552_v56 = vadd.f32 %v685_v52, %v551_v55  ;;  %v755_v57 = vpop.f32.mrb[6].mxu1 }
 0x1ed   : > { %v568_v58 = vmax.f32 %v560_v54, 0.0  ;;  %v563_v59 = vadd.f32 %v755_v57, %v685_v52  ;;  %v554_v60 = vpop.f32.mrb[7].mxu1 }
 0x1ee   : > { %v555_v61 = vadd.f32 %v685_v52, %v554_v60  ;;  %v566_v0 = vmax.f32 %v552_v56, 0.0 }
 0x1ef   : > { %v697_v62 = vpack.c.bf16 %v568_v58, %v568_v58  ;;  %v569_v63 = vmax.f32 %v563_v59, 0.0 }
 0x1f0   : > { %v567_v2 = vmax.f32 %v555_v61, 0.0 }
 0x1f1   : > { %588 = vst [vmem:[%s197_s14 + $0x8] sm:$0xf] %v697_v62  ;;  %v698_v3 = vpack.c.bf16 %v569_v63, %v569_v63 }
 0x1f2   : > { %v702_v4 = vpack.c.bf16 %v567_v2, %v566_v0 }
 0x1f3   : > { %v593_v5 = vsel %vm591_vm5, %v698_v3, %v592_v1 }
 0x1f4   : > { %594 = vst [vmem:[%s197_s14 + $0xc] sm:$0x1] %v593_v5  ;;  %703 = vst [vmem:[%s197_s14] sm:$0xff] %v702_v4  }
 0x1f5 PF: > { %s14_s15 = sadd.s32 1, %s800_s15  }
 0x1f6   : > { %p11_p4 = scmp.ge.s32.totalorder %s14_s15, 4  }
 0x1f8   :  { %13 = sbr.rel (!%p11_p4) target bundleno = 1 (0x1), region = 66 }

</bundles_post_ra>
